<compile_context>
chip_gen: v6e
topology: v6e:2x2x1
jax: 0.10.0
libtpu: 0.0.40
codegen_flags: <defaults>
</compile_context>

<pallas_src>
import functools

import jax
import jax.numpy as jnp
import numpy as np
from jax.experimental import pallas as pl
from jax.experimental.pallas import tpu as pltpu


def _round_up(x, m):
    return (x + m - 1) // m * m


def qm_loss_kernel(*refs, inv_temp, masked):
    # refs (masked=True):
    #   bias_ref : VMEM (1, tc)   f32   0 for real classes, -1e30 for padded
    #   x_ref    : VMEM (tb, Dp)  f32   inputs tile (constant across C steps)
    #   feat_ref : VMEM (tc, Dp)  bf16  centroid-feature tile
    #   tgt_ref  : VMEM (tb, 1)   i32   integer class targets
    #   loss_ref : VMEM (tb, 128) f32   per-sample CE loss, lane-broadcast
    #   scratch  : xn (tb,Dp) bf16, m/l/t (tb,1) f32, col (tb,tc) i32
    if masked:
        (bias_ref, x_ref, feat_ref, tgt_ref, loss_ref,
         xn_ref, m_ref, l_ref, t_ref, col_ref) = refs
    else:
        (x_ref, feat_ref, tgt_ref, loss_ref,
         xn_ref, m_ref, l_ref, t_ref, col_ref) = refs
        bias_ref = None

    ci = pl.program_id(1)
    nc = pl.num_programs(1)
    tc = feat_ref.shape[0]

    @pl.when(ci == 0)
    def _init():
        # F.normalize(x, dim=1) with eps=1e-12, fused with the 1/temp scale.
        # Clamp ||x||^2 at eps^2 so all-zero rows give xn == 0 (not inf).
        x = x_ref[...].astype(jnp.float32)
        ss = jnp.sum(x * x, axis=1, keepdims=True)
        inv = jax.lax.rsqrt(jnp.maximum(ss, 1e-24)) * inv_temp
        xn_ref[...] = (x * inv).astype(xn_ref.dtype)      # bf16 for the MXU
        m_ref[...] = jnp.full_like(m_ref, -1e30)
        l_ref[...] = jnp.zeros_like(l_ref)
        t_ref[...] = jnp.zeros_like(t_ref)
        # Tile-local column indices, cached across C steps (target gather).
        col_ref[...] = jax.lax.broadcasted_iota(jnp.int32, col_ref.shape, 1)

    # (tb, tc) logits tile: bf16 x bf16 -> f32 accumulation on the MXU.
    # Contraction is dim 1 of BOTH operands (no transpose materialization).
    logits = jax.lax.dot_general(
        xn_ref[...], feat_ref[...],
        dimension_numbers=(((1,), (1,)), ((), ())),
        preferred_element_type=jnp.float32)
    if masked:
        # Additive mask: padded class columns -> -1e30 (cannot perturb lse).
        logits = logits + bias_ref[...]

    # Online softmax update (all state in f32).
    m_prev = m_ref[...]
    m_new = jnp.maximum(m_prev, jnp.max(logits, axis=1, keepdims=True))
    alpha = jnp.exp(m_prev - m_new)
    p = jnp.exp(logits - m_new)
    l_ref[...] = alpha * l_ref[...] + jnp.sum(p, axis=1, keepdims=True)
    # Target-logit gather: each row's target lands in exactly one C tile.
    is_tgt = col_ref[...] == (tgt_ref[...] - ci * tc)
    t_ref[...] = t_ref[...] + jnp.sum(
        jnp.where(is_tgt, logits, 0.0), axis=1, keepdims=True)
    m_ref[...] = m_new

    @pl.when(ci == nc - 1)
    def _finalize():
        loss = m_ref[...] + jnp.log(l_ref[...]) - t_ref[...]       # (tb, 1)
        # Lane-broadcast so the write-back is a full, unmasked store.
        loss_ref[...] = jnp.broadcast_to(loss, loss_ref.shape)


def queue_memory_loss(x, centroid_features, targets, temp, *, tb=None, tc=None):
    """loss = F.cross_entropy((F.normalize(x, dim=1) @ feats.T) / temp, targets)."""
    B, D = x.shape
    C, D2 = centroid_features.shape
    assert D == D2

    # ---- tile sizes -------------------------------------------------------
    Dp = _round_up(D, 128)
    if tc is None:
        tc = min(512, _round_up(C, 128))      # big C tiles; 512 is 256-aligned
    Cp = _round_up(C, tc)

    b8 = _round_up(B, 8)
    if tb is None:
        if b8 >= 512:
            tb = 256
        elif b8 >= 256:
            tb = 128        # >= 2 B tiles -> both v7x TensorCores get work
        else:
            tb = b8         # tiny batch: one tile (splitting re-streams feats)
    assert tb % 8 == 0
    Bp = _round_up(b8, tb)

    # ---- pad / cast only when needed (skip copies in the aligned case) ----
    if x.shape == (Bp, Dp) and x.dtype == jnp.float32:
        xp = x
    else:
        xp = jnp.zeros((Bp, Dp), jnp.float32).at[:B, :D].set(
            x.astype(jnp.float32))
    if (centroid_features.shape == (Cp, Dp)
            and centroid_features.dtype == jnp.bfloat16):
        fp = centroid_features
    else:
        fp = jnp.zeros((Cp, Dp), jnp.bfloat16).at[:C, :D].set(
            centroid_features.astype(jnp.bfloat16))
    if targets.shape == (B,) and targets.dtype == jnp.int32 and B == Bp:
        tgt2d = targets.reshape(Bp, 1)
    else:
        tgt2d = jnp.zeros((Bp, 1), jnp.int32).at[:B, 0].set(
            targets.astype(jnp.int32))

    masked = Cp != C
    grid = (Bp // tb, Cp // tc)
    n_btiles = grid[0]

    in_specs = []
    args = []
    if masked:
        bias = jnp.full((1, Cp), -1e30, jnp.float32).at[:, :C].set(0.0)
        in_specs.append(pl.BlockSpec((1, tc), lambda bi, ci: (0, ci)))
        args.append(bias)
    in_specs += [
        pl.BlockSpec((tb, Dp), lambda bi, ci: (bi, 0)),   # inputs tile
        pl.BlockSpec((tc, Dp), lambda bi, ci: (ci, 0)),   # centroid-feature tile
        pl.BlockSpec((tb, 1), lambda bi, ci: (bi, 0)),    # targets
    ]
    args += [xp, fp, tgt2d]

    # VMEM budget: double-buffered inputs + scratch + elementwise headroom.
    est = (2 * tb * Dp * 4            # x tile (f32), double-buffered
           + 2 * tc * Dp * 2          # feat tile (bf16), double-buffered
           + 2 * tc * 4               # bias row
           + 4 * tb * 128 * 4         # targets / output tiles (lane-padded)
           + tb * Dp * 2              # xn scratch (bf16)
           + tb * tc * 4              # column-iota scratch
           + 3 * tb * 128 * 4         # m / l / t scratch (lane-padded)
           + 6 * tb * tc * 4)         # logits / exp intermediates headroom
    vmem_limit = int(min(48 * 2 ** 20, max(est * 3 // 2, 24 * 2 ** 20)))

    bytes_accessed = (n_btiles * Cp * Dp * 2   # feat table re-read per B tile
                      + Bp * Dp * 4            # inputs
                      + Bp * 128 * 4           # per-sample loss (lane-broadcast)
                      + Bp * 4                 # targets
                      + (n_btiles * Cp * 4 if masked else 0))

    kernel = functools.partial(
        qm_loss_kernel, inv_temp=float(1.0 / temp), masked=masked)

    per_sample = pl.pallas_call(
        kernel,
        out_shape=jax.ShapeDtypeStruct((Bp, 128), jnp.float32),
        grid_spec=pltpu.PrefetchScalarGridSpec(
            num_scalar_prefetch=0,
            grid=grid,
            in_specs=in_specs,
            out_specs=pl.BlockSpec((tb, 128), lambda bi, ci: (bi, 0)),
            scratch_shapes=[
                pltpu.VMEM((tb, Dp), jnp.bfloat16),   # normalized/temp-scaled x
                pltpu.VMEM((tb, 1), jnp.float32),     # running max
                pltpu.VMEM((tb, 1), jnp.float32),     # running sum-exp
                pltpu.VMEM((tb, 1), jnp.float32),     # target logit
                pltpu.VMEM((tb, tc), jnp.int32),      # tile-local column iota
            ]),
        compiler_params=pltpu.CompilerParams(
            dimension_semantics=("parallel", "arbitrary"),
            vmem_limit_bytes=vmem_limit),
        cost_estimate=pl.CostEstimate(
            flops=2 * Bp * Cp * Dp,
            transcendentals=Bp * Cp + Bp * (Cp // tc) + 2 * Bp,
            bytes_accessed=bytes_accessed),
    )(*args)

    # Padded B rows are dropped before the mean; lane 0 carries the loss.
    return jnp.mean(per_sample[:B, 0])


def queue_memory_loss_ref(x, centroid_features, targets, temp):
    """Pure-JAX reference for sanity checking."""
    norm = jnp.sqrt(jnp.sum(x * x, axis=1, keepdims=True))
    xn = x / jnp.maximum(norm, 1e-12)
    logits = xn @ centroid_features.T / temp
    lse = jax.scipy.special.logsumexp(logits, axis=1)
    tgt_logit = jnp.take_along_axis(logits, targets[:, None], axis=1)[:, 0]
    return jnp.mean(lse - tgt_logit)


if __name__ == "__main__":
    # Small shapes consistent with the module (deliberately not multiples of
    # 128 so the padding + in-kernel bias-masking path is exercised).
    D, C = 48, 200

    # Module parameters (deterministic, from __init__ / forward defaults):
    temp = 0.05         # self.temp
    momentum = 0.2      # self.momentum (no effect on the forward output)
    weight_decay = 0.1  # forward's default weight_decay (backward-only)
    # TODO(synk): QM.backward's queue update (queues.update with momentum /
    # weight_decay) is a training-time side effect with no forward-pass
    # compute; it is not part of this kernel.

    key = jax.random.PRNGKey(0)
    kx, kf, kt, kx2, kt2 = jax.random.split(key, 5)
    centroid_features = jax.random.normal(kf, (C, D), dtype=jnp.float32)
    centroid_features = centroid_features / jnp.linalg.norm(
        centroid_features, axis=1, keepdims=True)

    # Test 1: default tiles (single B tile, single C tile after padding).
    B1 = 8
    x1 = jax.random.normal(kx, (B1, D), dtype=jnp.float32)
    t1 = jax.random.randint(kt, (B1,), 0, C, dtype=jnp.int32)
    loss1 = jax.block_until_ready(
        queue_memory_loss(x1, centroid_features, t1, temp))
    ref1 = queue_memory_loss_ref(x1, centroid_features, t1, temp)
    # bf16 MXU operands -> slightly looser tolerance than a pure-f32 kernel.
    np.testing.assert_allclose(np.asarray(loss1), np.asarray(ref1),
                               rtol=2e-2, atol=2e-2)

    # Test 2: small explicit tiles to exercise the multi-B-tile / multi-C-tile
    # online-softmax path and the per-B-tile re-initialization.
    B2 = 24
    x2 = jax.random.normal(kx2, (B2, D), dtype=jnp.float32)
    t2 = jax.random.randint(kt2, (B2,), 0, C, dtype=jnp.int32)
    loss2 = jax.block_until_ready(
        queue_memory_loss(x2, centroid_features, t2, temp, tb=8, tc=128))
    ref2 = queue_memory_loss_ref(x2, centroid_features, t2, temp)
    np.testing.assert_allclose(np.asarray(loss2), np.asarray(ref2),
                               rtol=2e-2, atol=2e-2)

    print("KERNEL_OK")
</pallas_src>

<mosaic_0001>
module attributes {stable_mosaic.version = 11 : i64} {
  func.func @qm_loss_kernel(%arg0: i32, %arg1: i32, %arg2: memref<1x256xf32, #tpu.memory_space<vmem>>, %arg3: memref<8x128xf32, #tpu.memory_space<vmem>>, %arg4: memref<256x128xbf16, #tpu.memory_space<vmem>>, %arg5: memref<8x1xi32, #tpu.memory_space<vmem>>, %arg6: memref<8x128xf32, #tpu.memory_space<vmem>>, %arg7: memref<8x128xbf16, #tpu.memory_space<vmem>>, %arg8: memref<8x1xf32, #tpu.memory_space<vmem>>, %arg9: memref<8x1xf32, #tpu.memory_space<vmem>>, %arg10: memref<8x1xf32, #tpu.memory_space<vmem>>, %arg11: memref<8x256xi32, #tpu.memory_space<vmem>>) attributes {dimension_semantics = [#tpu.dimension_semantics<parallel>, #tpu.dimension_semantics<arbitrary>], iteration_bounds = array<i64: 1, 1>, scalar_prefetch = 0 : i64, scratch_operands = 5 : i64, tpu.core_type = #tpu.core_type<tc>, window_params = [{transform_indices = @transform_0, window_bounds = array<i64: 1, 256>}, {transform_indices = @transform_1, window_bounds = array<i64: 8, 128>}, {transform_indices = @transform_2, window_bounds = array<i64: 256, 128>}, {transform_indices = @transform_3, window_bounds = array<i64: 8, 1>}, {transform_indices = @transform_4, window_bounds = array<i64: 8, 128>}]} {
    %c0_i32 = arith.constant 0 : i32
    %0 = arith.cmpi eq, %arg1, %c0_i32 : i32
    %1 = arith.extui %0 : i1 to i32
    %c0_i32_0 = arith.constant 0 : i32
    %2 = arith.cmpi ne, %1, %c0_i32_0 : i32
    scf.if %2 {
      %c0_28 = arith.constant 0 : index
      %c0_29 = arith.constant 0 : index
      %42 = vector.load %arg3[%c0_28, %c0_29] : memref<8x128xf32, #tpu.memory_space<vmem>>, vector<8x128xf32>
      %43 = arith.mulf %42, %42 : vector<8x128xf32>
      %cst_30 = arith.constant dense<0.000000e+00> : vector<8xf32>
      %44 = vector.multi_reduction <add>, %43, %cst_30 [1] : vector<8x128xf32> to vector<8xf32>
      %45 = vector.shape_cast %44 : vector<8xf32> to vector<8x1xf32>
      %cst_31 = arith.constant 1.000000e-24 : f32
      %46 = vector.broadcast %cst_31 : f32 to vector<8x1xf32>
      %47 = arith.maximumf %45, %46 : vector<8x1xf32>
      %48 = math.rsqrt %47 : vector<8x1xf32>
      %cst_32 = arith.constant 2.000000e+01 : f32
      %49 = vector.broadcast %cst_32 : f32 to vector<8x1xf32>
      %50 = arith.mulf %48, %49 : vector<8x1xf32>
      %51 = vector.broadcast %50 : vector<8x1xf32> to vector<8x128xf32>
      %52 = arith.mulf %42, %51 : vector<8x128xf32>
      %53 = arith.truncf %52 : vector<8x128xf32> to vector<8x128xbf16>
      %c0_33 = arith.constant 0 : index
      %c0_34 = arith.constant 0 : index
      %54 = vector.load %arg7[%c0_33, %c0_34] : memref<8x128xbf16, #tpu.memory_space<vmem>>, vector<8x128xbf16>
      tpu.vector_store %arg7[%c0_33, %c0_34], %53 {strides = array<i32>} : memref<8x128xbf16, #tpu.memory_space<vmem>>, vector<8x128xbf16>,
      %cst_35 = arith.constant -1.000000e+30 : f32
      %55 = vector.broadcast %cst_35 : f32 to vector<8x1xf32>
      %c0_36 = arith.constant 0 : index
      %c0_37 = arith.constant 0 : index
      %56 = vector.load %arg8[%c0_36, %c0_37] : memref<8x1xf32, #tpu.memory_space<vmem>>, vector<8x1xf32>
      tpu.vector_store %arg8[%c0_36, %c0_37], %55 {strides = array<i32>} : memref<8x1xf32, #tpu.memory_space<vmem>>, vector<8x1xf32>,
      %cst_38 = arith.constant 0.000000e+00 : f32
      %57 = vector.broadcast %cst_38 : f32 to vector<8x1xf32>
      %c0_39 = arith.constant 0 : index
      %c0_40 = arith.constant 0 : index
      %58 = vector.load %arg9[%c0_39, %c0_40] : memref<8x1xf32, #tpu.memory_space<vmem>>, vector<8x1xf32>
      tpu.vector_store %arg9[%c0_39, %c0_40], %57 {strides = array<i32>} : memref<8x1xf32, #tpu.memory_space<vmem>>, vector<8x1xf32>,
      %cst_41 = arith.constant 0.000000e+00 : f32
      %59 = vector.broadcast %cst_41 : f32 to vector<8x1xf32>
      %c0_42 = arith.constant 0 : index
      %c0_43 = arith.constant 0 : index
      %60 = vector.load %arg10[%c0_42, %c0_43] : memref<8x1xf32, #tpu.memory_space<vmem>>, vector<8x1xf32>
      tpu.vector_store %arg10[%c0_42, %c0_43], %59 {strides = array<i32>} : memref<8x1xf32, #tpu.memory_space<vmem>>, vector<8x1xf32>,
      %61 = tpu.iota {dimensions = array<i32: 1>} : vector<8x256xi32>
      %c0_44 = arith.constant 0 : index
      %c0_45 = arith.constant 0 : index
      %62 = vector.load %arg11[%c0_44, %c0_45] : memref<8x256xi32, #tpu.memory_space<vmem>>, vector<8x256xi32>
      tpu.vector_store %arg11[%c0_44, %c0_45], %61 {strides = array<i32>} : memref<8x256xi32, #tpu.memory_space<vmem>>, vector<8x256xi32>,
    } else {
    }
    %c0 = arith.constant 0 : index
    %c0_1 = arith.constant 0 : index
    %3 = vector.load %arg7[%c0, %c0_1] : memref<8x128xbf16, #tpu.memory_space<vmem>>, vector<8x128xbf16>
    %c0_2 = arith.constant 0 : index
    %c0_3 = arith.constant 0 : index
    %4 = vector.load %arg4[%c0_2, %c0_3] : memref<256x128xbf16, #tpu.memory_space<vmem>>, vector<256x128xbf16>
    %cst = arith.constant dense<0.000000e+00> : vector<8x256xf32>
    %5 = tpu.matmul %3, %4, %cst {dimension_numbers = #tpu.dot_dimension_numbers<[1], [1], [0], [0], [0, 0, 1, 0], [], []>} : vector<8x128xbf16>, vector<256x128xbf16>, vector<8x256xf32> -> vector<8x256xf32>
    %c0_4 = arith.constant 0 : index
    %c0_5 = arith.constant 0 : index
    %6 = vector.load %arg2[%c0_4, %c0_5] : memref<1x256xf32, #tpu.memory_space<vmem>>, vector<1x256xf32>
    %7 = vector.broadcast %6 : vector<1x256xf32> to vector<8x256xf32>
    %8 = arith.addf %5, %7 : vector<8x256xf32>
    %c0_6 = arith.constant 0 : index
    %c0_7 = arith.constant 0 : index
    %9 = vector.load %arg8[%c0_6, %c0_7] : memref<8x1xf32, #tpu.memory_space<vmem>>, vector<8x1xf32>
    %cst_8 = arith.constant dense<0xFF800000> : vector<8xf32>
    %10 = vector.multi_reduction <maximumf>, %8, %cst_8 [1] : vector<8x256xf32> to vector<8xf32>
    %11 = vector.shape_cast %10 : vector<8xf32> to vector<8x1xf32>
    %12 = arith.maximumf %9, %11 : vector<8x1xf32>
    %13 = arith.subf %9, %12 : vector<8x1xf32>
    %14 = math.exp %13 : vector<8x1xf32>
    %15 = vector.broadcast %12 : vector<8x1xf32> to vector<8x256xf32>
    %16 = arith.subf %8, %15 : vector<8x256xf32>
    %17 = math.exp %16 : vector<8x256xf32>
    %c0_9 = arith.constant 0 : index
    %c0_10 = arith.constant 0 : index
    %18 = vector.load %arg9[%c0_9, %c0_10] : memref<8x1xf32, #tpu.memory_space<vmem>>, vector<8x1xf32>
    %19 = arith.mulf %14, %18 : vector<8x1xf32>
    %cst_11 = arith.constant dense<0.000000e+00> : vector<8xf32>
    %20 = vector.multi_reduction <add>, %17, %cst_11 [1] : vector<8x256xf32> to vector<8xf32>
    %21 = vector.shape_cast %20 : vector<8xf32> to vector<8x1xf32>
    %22 = arith.addf %19, %21 : vector<8x1xf32>
    %c0_12 = arith.constant 0 : index
    %c0_13 = arith.constant 0 : index
    %23 = vector.load %arg9[%c0_12, %c0_13] : memref<8x1xf32, #tpu.memory_space<vmem>>, vector<8x1xf32>
    tpu.vector_store %arg9[%c0_12, %c0_13], %22 {strides = array<i32>} : memref<8x1xf32, #tpu.memory_space<vmem>>, vector<8x1xf32>,
    %c0_14 = arith.constant 0 : index
    %c0_15 = arith.constant 0 : index
    %24 = vector.load %arg11[%c0_14, %c0_15] : memref<8x256xi32, #tpu.memory_space<vmem>>, vector<8x256xi32>
    %c0_16 = arith.constant 0 : index
    %c0_17 = arith.constant 0 : index
    %25 = vector.load %arg5[%c0_16, %c0_17] : memref<8x1xi32, #tpu.memory_space<vmem>>, vector<8x1xi32>
    %c256_i32 = arith.constant 256 : i32
    %26 = arith.muli %arg1, %c256_i32 : i32
    %27 = vector.broadcast %26 : i32 to vector<8x1xi32>
    %28 = arith.subi %25, %27 : vector<8x1xi32>
    %29 = vector.broadcast %28 : vector<8x1xi32> to vector<8x256xi32>
    %30 = arith.cmpi eq, %24, %29 : vector<8x256xi32>
    %c0_18 = arith.constant 0 : index
    %c0_19 = arith.constant 0 : index
    %31 = vector.load %arg10[%c0_18, %c0_19] : memref<8x1xf32, #tpu.memory_space<vmem>>, vector<8x1xf32>
    %cst_20 = arith.constant 0.000000e+00 : f32
    %32 = vector.broadcast %cst_20 : f32 to vector<8x256xf32>
    %33 = arith.select %30, %8, %32 : vector<8x256xi1>, vector<8x256xf32>
    %cst_21 = arith.constant dense<0.000000e+00> : vector<8xf32>
    %34 = vector.multi_reduction <add>, %33, %cst_21 [1] : vector<8x256xf32> to vector<8xf32>
    %35 = vector.shape_cast %34 : vector<8xf32> to vector<8x1xf32>
    %36 = arith.addf %31, %35 : vector<8x1xf32>
    %c0_22 = arith.constant 0 : index
    %c0_23 = arith.constant 0 : index
    %37 = vector.load %arg10[%c0_22, %c0_23] : memref<8x1xf32, #tpu.memory_space<vmem>>, vector<8x1xf32>
    tpu.vector_store %arg10[%c0_22, %c0_23], %36 {strides = array<i32>} : memref<8x1xf32, #tpu.memory_space<vmem>>, vector<8x1xf32>,
    %c0_24 = arith.constant 0 : index
    %c0_25 = arith.constant 0 : index
    %38 = vector.load %arg8[%c0_24, %c0_25] : memref<8x1xf32, #tpu.memory_space<vmem>>, vector<8x1xf32>
    tpu.vector_store %arg8[%c0_24, %c0_25], %12 {strides = array<i32>} : memref<8x1xf32, #tpu.memory_space<vmem>>, vector<8x1xf32>,
    %c0_i32_26 = arith.constant 0 : i32
    %39 = arith.cmpi eq, %arg1, %c0_i32_26 : i32
    %40 = arith.extui %39 : i1 to i32
    %c0_i32_27 = arith.constant 0 : i32
    %41 = arith.cmpi ne, %40, %c0_i32_27 : i32
    scf.if %41 {
      %c0_28 = arith.constant 0 : index
      %c0_29 = arith.constant 0 : index
      %42 = vector.load %arg8[%c0_28, %c0_29] : memref<8x1xf32, #tpu.memory_space<vmem>>, vector<8x1xf32>
      %c0_30 = arith.constant 0 : index
      %c0_31 = arith.constant 0 : index
      %43 = vector.load %arg9[%c0_30, %c0_31] : memref<8x1xf32, #tpu.memory_space<vmem>>, vector<8x1xf32>
      %44 = math.log %43 : vector<8x1xf32>
      %45 = arith.addf %42, %44 : vector<8x1xf32>
      %c0_32 = arith.constant 0 : index
      %c0_33 = arith.constant 0 : index
      %46 = vector.load %arg10[%c0_32, %c0_33] : memref<8x1xf32, #tpu.memory_space<vmem>>, vector<8x1xf32>
      %47 = arith.subf %45, %46 : vector<8x1xf32>
      %48 = vector.shape_cast %47 : vector<8x1xf32> to vector<8x1xf32>
      %49 = vector.broadcast %48 : vector<8x1xf32> to vector<8x128xf32>
      %c0_34 = arith.constant 0 : index
      %c0_35 = arith.constant 0 : index
      %50 = vector.load %arg6[%c0_34, %c0_35] : memref<8x128xf32, #tpu.memory_space<vmem>>, vector<8x128xf32>
      tpu.vector_store %arg6[%c0_34, %c0_35], %49 {strides = array<i32>} : memref<8x128xf32, #tpu.memory_space<vmem>>, vector<8x128xf32>,
    } else {
    }
    return
  }
  func.func @transform_0(%arg0: i32, %arg1: i32) -> (i32, i32) {
    %c0_i32 = arith.constant 0 : i32
    %c0_i32_0 = arith.constant 0 : i32
    return %c0_i32, %arg1 : i32, i32
  }
  func.func @transform_1(%arg0: i32, %arg1: i32) -> (i32, i32) {
    %c0_i32 = arith.constant 0 : i32
    %c0_i32_0 = arith.constant 0 : i32
    return %arg0, %c0_i32 : i32, i32
  }
  func.func @transform_2(%arg0: i32, %arg1: i32) -> (i32, i32) {
    %c0_i32 = arith.constant 0 : i32
    %c0_i32_0 = arith.constant 0 : i32
    return %arg1, %c0_i32 : i32, i32
  }
  func.func @transform_3(%arg0: i32, %arg1: i32) -> (i32, i32) {
    %c0_i32 = arith.constant 0 : i32
    %c0_i32_0 = arith.constant 0 : i32
    return %arg0, %c0_i32 : i32, i32
  }
  func.func @transform_4(%arg0: i32, %arg1: i32) -> (i32, i32) {
    %c0_i32 = arith.constant 0 : i32
    %c0_i32_0 = arith.constant 0 : i32
    return %arg0, %c0_i32 : i32, i32
  }
}

</mosaic_0001>

<bundles_post_ra>
// kernel: tpu_custom_call.1
= control target key start
LH: loop header
LB: loop body
LE: loop exit
PB: predicated region body
PF: predicated region fallthrough
CT: control target
= control target key end

     0   :  { %9 = vsyncpa [#allocation8], 0  ;;  %s482_s0 = inlined_call_operand.vmem [shape: f32[1,256], index: 0, kind: input, shape index: {}]   ;;  %s483_s1 = inlined_call_operand.vmem [shape: f32[8,128], index: 1, kind: input, shape index: {}]   ;;  %s484_s2 = inlined_call_operand.hbm [shape: bf16[256,128], index: 2, kind: input, shape index: {}]   ;;  %s485_s3 = inlined_call_operand.vmem [shape: s32[8,1], index: 3, kind: input, shape index: {}]   ;;  %s486_s4 = inlined_call_operand.hbm [shape: f32[8,128], index: 4, kind: output, shape index: {}]  }
   0x1   :  { %10 = vsyncpa [#allocation9], 0  ;;  %s429_s15 = smov [#allocation7]  }
   0x2   :  { %s20_s16 = sshll.u32 %s429_s15, 4  ;;  %s21_s16 = int_to_ptr.vmem [resolvable:$true] %s20_s16 }
   0x3   :  { %s393_s17 = scalar_lea.vmem %s21_s16, 2048  ;;  %p398_p1 = scmp.lt.s32.totalorder %s21_s16, %s21_s16 }
   0x4   :  { %p394_p0 = scmp.ne.s32.totalorder %s21_s16, %s393_s17  ;;  %p399_p2 = scmp.lt.s32.totalorder %s393_s17, %s393_s17 }
   0x6   :  { %p400_p3 = por %p399_p2, %p398_p1 }
   0x8   :  { %p401_p4 = pnand %p400_p3, %p394_p0 }
   0xa   :  { %404 = shalt.err (!%p401_p4)
}
   0xb   :  { %s430_s18 = smov 64   ;;  %s431_s19 = smov 4  }
   0xc   :  { %26 = dma.hbm_to_vmem [thread:$0]  %s484_s2, 2048, %s21_s16, [#allocation8], %s430_s18, %s430_s18, %s431_s19  }
   0xd   :  { %425 = dma.done.wait [#allocation8], 2048  }
   0xe   :  { %426 = vsyncadd [#allocation8], 4294965248  ;;  %v37_v0 = vld [vmem:[%s483_s1] sm:$0xff]  ;;  %v359_v2 = vld [vmem:[#allocation7 + $0x78] sm:$0xff]   ;;  %vm47_vm0 = vcmask 7168   ;;  %v51_v26 = vlaneseq  ;;  %v433_v40 = vmov 0  }
   0xf   :  { %v38_v1 = vmul.f32 %v37_v0, %v37_v0  ;;  %v360_v3 = vld [vmem:[#allocation7 + $0x38] sm:$0xff]   ;;  %332 = vmatprep.subr.bf16.mxu0 %v359_v2  ;;  %v361_v4 = vld [vmem:[#allocation7 + $0x70] sm:$0xff]   ;;  %v363_v6 = vld [vmem:[#allocation7 + $0x68] sm:$0xff]   ;;  %v432_v25 = vmov -1e+30   ;;  %357 = vset.pattern.permute.xlu1 %v433_v40  ;;  %v434_v41 = vmov 0.0  }
  0x10   :  { %333 = vmatpush3.bf16.xpose.msra.mxu0 %v360_v3  ;;  %v362_v5 = vld [vmem:[#allocation7 + $0x30] sm:$0xff]   ;;  %v364_v7 = vld [vmem:[#allocation7 + $0x28] sm:$0xff]   ;;  %v365_v8 = vld [vmem:[#allocation7 + $0x60] sm:$0xff]   ;;  %48 = vst.msk [vmem:[#allocation3] sm:$0xff] %vm47_vm0, %v432_v25  ;;  %v92_v27 = vshrl.u32 %v51_v26, 7  ;;  %358 = vset.pattern.permute.xlu0 %v433_v40  ;;  %v52_v47 = vand.u32 127, %v51_v26 }
  0x11   :  { %39 = vadd.xlane.f32.xlu0 %v38_v1  ;;  %334 = vmatprep.subr.bf16.mxu0 %v361_v4  ;;  %v366_v9 = vld [vmem:[#allocation7 + $0x20] sm:$0xff]   ;;  %v367_v10 = vld [vmem:[#allocation7 + $0x58] sm:$0xff]   ;;  %v369_v12 = vld [vmem:[#allocation7 + $0x50] sm:$0xff]   ;;  %50 = vst.msk [vmem:[#allocation5] sm:$0xff] %vm47_vm0, %v434_v41 }
  0x12   :  { %v368_v11 = vld [vmem:[#allocation7 + $0x18] sm:$0xff]   ;;  %v370_v13 = vld [vmem:[#allocation7 + $0x10] sm:$0xff]   ;;  %v371_v14 = vld [vmem:[#allocation7 + $0x48] sm:$0xff]   ;;  %v93_v28 = vsub.s32 0, %v92_v27  ;;  %v97_v29 = vsub.s32 1, %v92_v27  ;;  %49 = vst.msk [vmem:[#allocation4] sm:$0xff] %vm47_vm0, %v434_v41 }
  0x13   :  { %v372_v15 = vld [vmem:[#allocation7 + $0x8] sm:$0xff]   ;;  %v373_v16 = vld [vmem:[#allocation7 + $0x40] sm:$0xff]   ;;  %v53_v51 = vadd.s32 128, %v52_v47 }
  0x14   :  { %v374_v17 = vld [vmem:[#allocation7] sm:$0xff]  }
  0x15   :  { %v89_v30 = vld [vmem:[%s482_s0] sm:$0x3] }
  0x16   :  { %v94_v31 = vrot.slane %v89_v30, %v93_v28  ;;  %v98_v32 = vrot.slane %v89_v30, %v97_v29  ;;  %v267_v46 = vld [vmem:[%s485_s3] sm:$0xff]  ;;  %s435_s3 = smov [#allocation10]  }
  0x17   :  { %v238_v42 = vld [vmem:[#allocation3] sm:$0xff]  ;;  %s307_s25 = sshll.u32 %s435_s3, 4  ;;  %s308_s25 = int_to_ptr.vmem [resolvable:$true] %s307_s25 }
  0x18   :  { %335 = vmatpush3.bf16.xpose.msra.mxu0 %v362_v5  ;;  %v276_v62 = vld [vmem:[#allocation5] sm:$0xff]  ;;  %s405_s26 = scalar_lea.vmem %s308_s25, 128  ;;  %p410_p6 = scmp.lt.s32.totalorder %s308_s25, %s308_s25 }
  0x19   :  { %336 = vmatprep.subr.bf16.mxu0 %v363_v6  ;;  %v257_v2 = vld [vmem:[#allocation4] sm:$0xff]  ;;  %p406_p5 = scmp.ne.s32.totalorder %s308_s25, %s405_s26  ;;  %p411_p7 = scmp.lt.s32.totalorder %s405_s26, %s405_s26 }
  0x1b   :  { %p412_p8 = por %p411_p7, %p410_p6 }
  0x1d   :  { %p413_p9 = pnand %p412_p8, %p406_p5 }
  0x20   :  { %337 = vmatpush3.bf16.xpose.msra.mxu0 %v364_v7 }
  0x21   :  { %338 = vmatprep.subr.bf16.mxu0 %v365_v8 }
  0x28   :  { %339 = vmatpush3.bf16.xpose.msra.mxu0 %v366_v9 }
  0x29   :  { %340 = vmatprep.subr.bf16.mxu0 %v367_v10 }
  0x30   :  { %341 = vmatpush3.bf16.xpose.msra.mxu0 %v368_v11 }
  0x31   :  { %342 = vmatprep.subr.bf16.mxu0 %v369_v12 }
  0x38   :  { %343 = vmatpush3.bf16.xpose.msra.mxu0 %v370_v13 }
  0x39   :  { %344 = vmatprep.subr.bf16.mxu0 %v371_v14 }
  0x40   :  { %345 = vmatpush3.bf16.xpose.msra.mxu0 %v372_v15 }
  0x41   :  { %346 = vmatprep.subr.bf16.mxu0 %v373_v16 }
  0x48   :  { %347 = vmatpush3.bf16.xpose.msra.mxu0 %v374_v17 }
  0x9a   :  { %v40_v18 = vpop.xlane.xlu0 %39 }
  0x9b   :  { %v41_v19 = vmax.f32 %v40_v18, 1e-24 }
  0x9d   :  { %375 = vrsqrt.f32 %v41_v19 }
  0xaa   :  { %v376_v20 = vpop.eup %375 }
  0xab   :  { %v43_v21 = vmul.f32 20.0, %v376_v20 }
  0xad   :  { %v44_v22 = vmul.f32 %v43_v21, %v37_v0 }
  0xaf   :  { %v45_v23 = vpack.c.bf16 %v44_v22, %v44_v22 }
  0xb1   :  { %46 = vst [vmem:[#allocation2] sm:$0xf] %v45_v23 }
  0xb8   :  { %v56_v24 = vld [vmem:[#allocation2] sm:$0xf] }
  0xb9   :  { %348 = vmatprep.mubr.bf16.mxu0 %v56_v24 }
  0xba   :  { %349 = vmatmul.mubr.bf16.vlgmr.msra.gmra.mxu0 %v56_v24 }
 0x17a   :  { %v231_v33 = vpop.f32.mrf.mxu0 }
 0x17b   :  { %v232_v35 = vadd.f32 %v231_v33, %v94_v31 }
 0x17c   :  { %v233_v34 = vpop.f32.mrf.mxu0 }
 0x17d   :  { %v234_v36 = vadd.f32 %v233_v34, %v98_v32 }
 0x17e   :  { %v235_v37 = vpop.f32.mrf.mxu0 }
 0x17f   :  { %v239_v38 = vmax.f32 %v232_v35, %v234_v36 }
 0x180   :  { %v236_v39 = vpop.f32.mrf.mxu0 }
 0x181   :  { %240 = vmax.xlane.f32.xlu0 %v239_v38 }
 0x20a   :  { %v241_v43 = vpop.xlane.xlu0 %240 }
 0x20b   :  { %v242_v44 = vmax.f32 %v238_v42, %v241_v43 }
 0x20d   :  { %v243_v45 = vsub.f32 %v238_v42, %v242_v44  ;;  %284 = vst.msk [vmem:[#allocation3] sm:$0xff] %vm47_vm0, %v242_v44  ;;  %248 = vperm.xlu1 %357, %v242_v44  }
 0x20f   :  { %v244_v61 = vmul.f32 1.442695, %v243_v45 }
 0x211   :  { %272 = vperm.xlu1 %357, %v267_v46  }
 0x214   :  { %v288_v9 = vld [vmem:[#allocation3] sm:$0xff] }
 0x288   :  { %v249_v48 = vpop.permute.xlu1 %248 }
 0x289   :  { %v251_v49 = vsub.f32 %v232_v35, %v249_v48  ;;  %v252_v50 = vsub.f32 %v234_v36, %v249_v48 }
 0x28b   :  { %v253_v52 = vmul.f32 1.442695, %v251_v49  ;;  %v255_v53 = vmul.f32 1.442695, %v252_v50 }
 0x28c   :  { %v273_v54 = vpop.permute.xlu1 %272 }
 0x28d   :  { %377 = vpow2.f32 %v253_v52  ;;  %vm274_vm1 = vcmp.eq.s32.totalorder %v52_v47, %v273_v54  ;;  %vm275_vm2 = vcmp.eq.s32.totalorder %v53_v51, %v273_v54 }
 0x28e   :  { %379 = vpow2.f32 %v255_v53  ;;  %v277_v55 = vsel %vm274_vm1, %v232_v35, 0.0  ;;  %v278_v56 = vsel %vm275_vm2, %v234_v36, 0.0 }
 0x28f   :  { %v279_v57 = vadd.f32 %v278_v56, %v277_v55  ;;  %381 = vpow2.f32 %v244_v61 }
 0x291   :  { %280 = vadd.xlane.f32.xlu1 %v279_v57 }
 0x29a   :  { %v378_v58 = vpop.eup %377 }
 0x29b   :  { %v380_v59 = vpop.eup %379 }
 0x29c   :  { %v259_v60 = vadd.f32 %v380_v59, %v378_v58  ;;  %v382_v1 = vpop.eup %381 }
 0x29d   :  { %v258_v3 = vmul.f32 %v382_v1, %v257_v2 }
 0x29e   :  { %260 = vadd.xlane.f32.xlu0 %v259_v60 }
 0x31a   :  { %v281_v63 = vpop.xlane.xlu1 %280 }
 0x31b   :  { %v282_v0 = vadd.f32 %v281_v63, %v276_v62 }
 0x31d   :  { %283 = vst.msk [vmem:[#allocation5] sm:$0xff] %vm47_vm0, %v282_v0 }
 0x324   :  { %v293_v11 = vld [vmem:[#allocation5] sm:$0xff] }
 0x327   :  { %v261_v4 = vpop.xlane.xlu0 %260 }
 0x328   :  { %v262_v5 = vadd.f32 %v261_v4, %v258_v3 }
 0x32a   :  { %264 = vst.msk [vmem:[#allocation4] sm:$0xff] %vm47_vm0, %v262_v5 }
 0x331   :  { %v289_v6 = vld [vmem:[#allocation4] sm:$0xff] }
 0x332   :  { %383 = vlog2.f32 %v289_v6 }
 0x33f   :  { %v384_v7 = vpop.eup %383 }
 0x340   :  { %v291_v8 = vmul.f32 0.6931472, %v384_v7 }
 0x342   :  { %v292_v10 = vadd.f32 %v291_v8, %v288_v9 }
 0x344   :  { %v294_v12 = vsub.f32 %v292_v10, %v293_v11 }
 0x346   :  { %297 = vperm.xlu0 %358, %v294_v12  }
 0x3c1   :  { %v298_v13 = vpop.permute.xlu0 %297 }
 0x3c2   :  { %300 = vst [vmem:[#allocation10] sm:$0xff] %v298_v13 }
 0x3c3   :  { %416 = shalt.err (!%p413_p9)
}
 0x3c4   :  { %310 = dma.vmem_to_hbm [thread:$0]  %s308_s25, 128, %s486_s4, [#allocation9]  }
 0x3c5   :  { %427 = dma.done.wait [#allocation9], 128  }
 0x3c6   :  { %428 = vsyncadd [#allocation9], 4294967168 }
 0x3c7   :  { %314 = vsyncpa [#allocation8], 1 }
 0x3c8   :  { %315 = vsyncpa [#allocation9], 1 }

</bundles_post_ra>
